<compile_context>
chip_gen: v5e
topology: v5e:2x2
jax: 0.10.0
libtpu: 0.0.40
codegen_flags: <defaults>
</compile_context>

<pallas_src>
import jax
import jax.numpy as jnp
from jax.experimental import pallas as pl
from jax.experimental.pallas import tpu as pltpu


def _fusion_conv_kernel(xp_ref, xi_ref, wp_ref, wi_ref, shift_ref, o_ref):
    # xp_ref: (Cp, T)   xi_ref: (Ci, T)      -- H*W tile on the lane axis
    # wp_ref: (Co, Cp)  wi_ref: (Co, Ci)     -- BN scale already folded in
    # shift_ref: (Co, 1)                     -- folded conv bias + BN shift
    # o_ref: (Co, T)
    acc = jnp.dot(wp_ref[...], xp_ref[...], preferred_element_type=jnp.float32)
    acc = acc + jnp.dot(wi_ref[...], xi_ref[...], preferred_element_type=jnp.float32)
    o_ref[...] = jnp.maximum(acc + shift_ref[...], 0.0).astype(o_ref.dtype)


def _choose_tile_hw(hw, cap=2048):
    # Largest lane-aligned divisor of H*W (keeps the grid exact, no ragged tail),
    # capped so double-buffered blocks stay far below VMEM limits (incl. v7x 64 MiB).
    for t in (2048, 1024, 512, 256, 128):
        if t <= cap and hw % t == 0:
            return t
    return hw  # block == full dim is always legal


def fusion_conv(point_features, img_features, params, *, tile_hw=None,
                compute_dtype=jnp.float32):
    """point_features: (B, Cp, H, W), img_features: (B, Ci, H, W) -> (B, Co, H, W)."""
    conv_w = params["conv_w"]          # (Co, Cin) -- 1x1 conv weight squeezed
    conv_b = params["conv_b"]          # (Co,)
    gamma, beta = params["bn_gamma"], params["bn_beta"]
    mean, var, eps = params["bn_mean"], params["bn_var"], params["bn_eps"]

    B, Cp, H, W = point_features.shape
    Ci = img_features.shape[1]
    Co = conv_w.shape[0]
    HW = H * W

    if tile_hw is None:
        tile_hw = _choose_tile_hw(HW)
    assert HW % tile_hw == 0, "tile_hw must divide H*W"

    # Fold conv bias + BN (eval) into the weights and a per-channel shift.
    inv_std = 1.0 / jnp.sqrt(var.astype(jnp.float32) + eps)
    scale = gamma.astype(jnp.float32) * inv_std                          # (Co,)
    shift = ((conv_b - mean) * scale + beta).reshape(Co, 1).astype(jnp.float32)
    w_scaled = conv_w.astype(jnp.float32) * scale[:, None]               # (Co, Cin)
    wp = w_scaled[:, :Cp].astype(compute_dtype)                          # (Co, Cp)
    wi = w_scaled[:, Cp:].astype(compute_dtype)                          # (Ci cols) (Co, Ci)

    # NCHW -> (B, C, H*W): free reshape, channels stay on the sublane axis,
    # spatial on the lane axis.  No transposes.
    xp = point_features.reshape(B, Cp, HW).astype(compute_dtype)
    xi = img_features.reshape(B, Ci, HW).astype(compute_dtype)

    grid = (B, HW // tile_hw)

    out = pl.pallas_call(
        _fusion_conv_kernel,
        out_shape=jax.ShapeDtypeStruct((B, Co, HW), jnp.float32),
        grid_spec=pltpu.PrefetchScalarGridSpec(
            num_scalar_prefetch=0,
            grid=grid,
            in_specs=[
                pl.BlockSpec((None, Cp, tile_hw), lambda b, j: (b, 0, j)),
                pl.BlockSpec((None, Ci, tile_hw), lambda b, j: (b, 0, j)),
                pl.BlockSpec((Co, Cp), lambda b, j: (0, 0)),
                pl.BlockSpec((Co, Ci), lambda b, j: (0, 0)),
                pl.BlockSpec((Co, 1), lambda b, j: (0, 0)),
            ],
            out_specs=pl.BlockSpec((None, Co, tile_hw), lambda b, j: (b, 0, j)),
        ),
        compiler_params=pltpu.CompilerParams(
            dimension_semantics=("parallel", "parallel")),
    )(xp, xi, wp, wi, shift)

    # (B, Co, H*W) -> (B, Co, H, W): free reshape, output already NCHW.
    return out.reshape(B, Co, H, W)


def init_params(key, inplanes, outplanes):
    k_w, k_b, k_g, k_bt, k_m, k_v = jax.random.split(key, 6)
    # Deterministic synthetic init (shapes match nn.Conv2d(inplanes, outplanes, 1)
    # + nn.BatchNorm2d(outplanes)); not a checkpoint load.
    bound = 1.0 / jnp.sqrt(jnp.float32(inplanes))
    params = {
        "conv_w": jax.random.uniform(k_w, (outplanes, inplanes), jnp.float32, -bound, bound),
        "conv_b": jax.random.uniform(k_b, (outplanes,), jnp.float32, -bound, bound),
        "bn_gamma": 1.0 + 0.1 * jax.random.normal(k_g, (outplanes,), jnp.float32),
        "bn_beta": 0.1 * jax.random.normal(k_bt, (outplanes,), jnp.float32),
        "bn_mean": 0.1 * jax.random.normal(k_m, (outplanes,), jnp.float32),
        "bn_var": jnp.abs(1.0 + 0.1 * jax.random.normal(k_v, (outplanes,), jnp.float32)),
        "bn_eps": jnp.float32(1e-5),
    }
    return params


def _reference(point_features, img_features, params):
    # Pure-JAX reference of the PyTorch forward (BN in eval mode).
    x = jnp.concatenate([point_features, img_features], axis=1)  # (B, Cin, H, W)
    w = params["conv_w"]  # (Co, Cin)
    y = jnp.einsum("bchw,oc->bohw", x, w) + params["conv_b"][None, :, None, None]
    inv_std = 1.0 / jnp.sqrt(params["bn_var"] + params["bn_eps"])
    y = (y - params["bn_mean"][None, :, None, None]) * (params["bn_gamma"] * inv_std)[None, :, None, None] \
        + params["bn_beta"][None, :, None, None]
    return jnp.maximum(y, 0.0)


if __name__ == "__main__":
    key = jax.random.PRNGKey(0)
    k_p, k_i, k_params = jax.random.split(key, 3)

    B, Cp, Ci, H, W = 2, 4, 4, 16, 16
    inplanes = Cp + Ci
    outplanes = 16

    point_features = jax.random.normal(k_p, (B, Cp, H, W), jnp.float32)
    img_features = jax.random.normal(k_i, (B, Ci, H, W), jnp.float32)
    params = init_params(k_params, inplanes, outplanes)

    out = fusion_conv(point_features, img_features, params)
    out = jax.block_until_ready(out)

    ref = _reference(point_features, img_features, params)
    assert out.shape == (B, outplanes, H, W), out.shape
    assert jnp.allclose(out, ref, atol=1e-5, rtol=1e-5), float(jnp.max(jnp.abs(out - ref)))

    print("KERNEL_OK")
</pallas_src>

<mosaic_0001>
module attributes {stable_mosaic.version = 11 : i64} {
  func.func @_fusion_conv_kernel(%arg0: i32, %arg1: i32, %arg2: memref<1x4x256xf32, #tpu.memory_space<vmem>>, %arg3: memref<1x4x256xf32, #tpu.memory_space<vmem>>, %arg4: memref<16x4xf32, #tpu.memory_space<vmem>>, %arg5: memref<16x4xf32, #tpu.memory_space<vmem>>, %arg6: memref<16x1xf32, #tpu.memory_space<vmem>>, %arg7: memref<1x16x256xf32, #tpu.memory_space<vmem>>) attributes {dimension_semantics = [#tpu.dimension_semantics<parallel>, #tpu.dimension_semantics<parallel>], iteration_bounds = array<i64: 2, 1>, scalar_prefetch = 0 : i64, scratch_operands = 0 : i64, tpu.core_type = #tpu.core_type<tc>, window_params = [{transform_indices = @transform_0, window_bounds = array<i64: 1, 4, 256>}, {transform_indices = @transform_1, window_bounds = array<i64: 1, 4, 256>}, {pipeline_mode = #tpu.pipeline_mode<synchronous>, transform_indices = @transform_2, window_bounds = array<i64: 16, 4>}, {pipeline_mode = #tpu.pipeline_mode<synchronous>, transform_indices = @transform_3, window_bounds = array<i64: 16, 4>}, {pipeline_mode = #tpu.pipeline_mode<synchronous>, transform_indices = @transform_4, window_bounds = array<i64: 16, 1>}, {transform_indices = @transform_5, window_bounds = array<i64: 1, 16, 256>}]} {
    %c0 = arith.constant 0 : index
    %c0_0 = arith.constant 0 : index
    %0 = vector.load %arg4[%c0, %c0_0] : memref<16x4xf32, #tpu.memory_space<vmem>>, vector<16x4xf32>
    %c0_1 = arith.constant 0 : index
    %c0_2 = arith.constant 0 : index
    %c0_3 = arith.constant 0 : index
    %1 = vector.load %arg2[%c0_1, %c0_2, %c0_3] : memref<1x4x256xf32, #tpu.memory_space<vmem>>, vector<1x4x256xf32>
    %2 = vector.shape_cast %1 : vector<1x4x256xf32> to vector<4x256xf32>
    %cst = arith.constant dense<0.000000e+00> : vector<16x256xf32>
    %3 = tpu.matmul %0, %2, %cst {dimension_numbers = #tpu.dot_dimension_numbers<[1], [0], [0], [1], [0, 0, 1, 1], [], []>} : vector<16x4xf32>, vector<4x256xf32>, vector<16x256xf32> -> vector<16x256xf32>
    %c0_4 = arith.constant 0 : index
    %c0_5 = arith.constant 0 : index
    %4 = vector.load %arg5[%c0_4, %c0_5] : memref<16x4xf32, #tpu.memory_space<vmem>>, vector<16x4xf32>
    %c0_6 = arith.constant 0 : index
    %c0_7 = arith.constant 0 : index
    %c0_8 = arith.constant 0 : index
    %5 = vector.load %arg3[%c0_6, %c0_7, %c0_8] : memref<1x4x256xf32, #tpu.memory_space<vmem>>, vector<1x4x256xf32>
    %6 = vector.shape_cast %5 : vector<1x4x256xf32> to vector<4x256xf32>
    %cst_9 = arith.constant dense<0.000000e+00> : vector<16x256xf32>
    %7 = tpu.matmul %4, %6, %cst_9 {dimension_numbers = #tpu.dot_dimension_numbers<[1], [0], [0], [1], [0, 0, 1, 1], [], []>} : vector<16x4xf32>, vector<4x256xf32>, vector<16x256xf32> -> vector<16x256xf32>
    %8 = arith.addf %3, %7 : vector<16x256xf32>
    %c0_10 = arith.constant 0 : index
    %c0_11 = arith.constant 0 : index
    %9 = vector.load %arg6[%c0_10, %c0_11] : memref<16x1xf32, #tpu.memory_space<vmem>>, vector<16x1xf32>
    %10 = vector.broadcast %9 : vector<16x1xf32> to vector<16x256xf32>
    %11 = arith.addf %8, %10 : vector<16x256xf32>
    %cst_12 = arith.constant 0.000000e+00 : f32
    %12 = vector.broadcast %cst_12 : f32 to vector<16x256xf32>
    %13 = arith.maximumf %11, %12 : vector<16x256xf32>
    %c0_13 = arith.constant 0 : index
    %c0_14 = arith.constant 0 : index
    %c0_15 = arith.constant 0 : index
    %14 = vector.load %arg7[%c0_13, %c0_14, %c0_15] : memref<1x16x256xf32, #tpu.memory_space<vmem>>, vector<1x16x256xf32>
    %15 = vector.shape_cast %14 : vector<1x16x256xf32> to vector<16x256xf32>
    %16 = vector.shape_cast %13 : vector<16x256xf32> to vector<1x16x256xf32>
    tpu.vector_store %arg7[%c0_13, %c0_14, %c0_15], %16 {strides = array<i32>} : memref<1x16x256xf32, #tpu.memory_space<vmem>>, vector<1x16x256xf32>,
    return
  }
  func.func @transform_0(%arg0: i32, %arg1: i32) -> (i32, i32, i32) {
    %c0_i32 = arith.constant 0 : i32
    %c0_i32_0 = arith.constant 0 : i32
    return %arg0, %c0_i32, %arg1 : i32, i32, i32
  }
  func.func @transform_1(%arg0: i32, %arg1: i32) -> (i32, i32, i32) {
    %c0_i32 = arith.constant 0 : i32
    %c0_i32_0 = arith.constant 0 : i32
    return %arg0, %c0_i32, %arg1 : i32, i32, i32
  }
  func.func @transform_2(%arg0: i32, %arg1: i32) -> (i32, i32) {
    %c0_i32 = arith.constant 0 : i32
    %c0_i32_0 = arith.constant 0 : i32
    %c0_i32_1 = arith.constant 0 : i32
    return %c0_i32, %c0_i32_0 : i32, i32
  }
  func.func @transform_3(%arg0: i32, %arg1: i32) -> (i32, i32) {
    %c0_i32 = arith.constant 0 : i32
    %c0_i32_0 = arith.constant 0 : i32
    %c0_i32_1 = arith.constant 0 : i32
    return %c0_i32, %c0_i32_0 : i32, i32
  }
  func.func @transform_4(%arg0: i32, %arg1: i32) -> (i32, i32) {
    %c0_i32 = arith.constant 0 : i32
    %c0_i32_0 = arith.constant 0 : i32
    %c0_i32_1 = arith.constant 0 : i32
    return %c0_i32, %c0_i32_0 : i32, i32
  }
  func.func @transform_5(%arg0: i32, %arg1: i32) -> (i32, i32, i32) {
    %c0_i32 = arith.constant 0 : i32
    %c0_i32_0 = arith.constant 0 : i32
    return %arg0, %c0_i32, %arg1 : i32, i32, i32
  }
}

</mosaic_0001>

<bundles_post_ra>
// kernel: tpu_custom_call.1
= control target key start
LH: loop header
LB: loop body
LE: loop exit
PB: predicated region body
PF: predicated region fallthrough
CT: control target
= control target key end

     0   :  { %10 = vsyncpa [#allocation3], 0  ;;  %s889_s0 = inlined_call_operand.vmem [shape: f32[2,4,256], index: 0, kind: input, shape index: {}]   ;;  %s890_s1 = inlined_call_operand.vmem [shape: f32[2,4,256], index: 1, kind: input, shape index: {}]   ;;  %s891_s2 = inlined_call_operand.vmem [shape: f32[16,4], index: 2, kind: input, shape index: {}]   ;;  %s892_s3 = inlined_call_operand.vmem [shape: f32[16,4], index: 3, kind: input, shape index: {}]   ;;  %s893_s4 = inlined_call_operand.vmem [shape: f32[16,1], index: 4, kind: input, shape index: {}]   ;;  %s894_s5 = inlined_call_operand.hbm [shape: f32[2,16,256], index: 5, kind: output, shape index: {}]  }
   0x1   :  { %12 = vsyncpa [#allocation3 + $0x1], 0  ;;  %s759_s18 = smov 0   ;;  %s761_s19 = smov 0  }
   0x2   :  { %s763_s20 = smov 0   ;;  %s765_s21 = smov 0  }
   0x3   :  { %s767_s22 = smov 0   ;;  %s769_s23 = smov 0  }
   0x4 LB: > { %s557_s24 = sadd.s32 4294967295, %s724_s23   ;;  %s558_s25 = sadd.s32 4294967294, %s724_s23   ;;  %s724_s23 = sphi %s769_s23, %s18_s23   ;;  %s720_s22 = sphi %s767_s22, %s901_s22   ;;  %s716_s21 = sphi %s765_s21, %s900_s21   ;;  %s712_s20 = sphi %s763_s20, %s899_s20   ;;  %s708_s19 = sphi %s761_s19, %s898_s19   ;;  %s704_s18 = sphi %s759_s18, %s897_s18  }
   0x5   : > { %s30_s26 = sadd.s32 1, %s720_s22  ;;  %s158_s27 = sadd.s32 1, %s712_s20 }
   0x6   : > { %p32_p0 = scmp.ge.s32.totalorder %s30_s26, 2  ;;  %p168_p1 = scmp.ne.s32.totalorder %s712_s20, %s708_s19 }
   0x7   : > { %p169_p2 = scmp.eq.s32.totalorder %s557_s24, 1  ;;  %p174_p3 = scmp.ne.s32.totalorder %s708_s19, %s704_s18 }
   0x8   : > { %s903_s26 = smov (%p32_p0, %s30_s26), 0  ;;  %p175_p5 = scmp.eq.s32.totalorder %s558_s25, 1 }
   0x9   : > { %p799_p4 = por %p169_p2, %p168_p1  ;;  %s153_s29 = ssub.s32 %s720_s22, %s903_s26 }
   0xa   : > { %p561_p6 = scmp.ge.s32.totalorder %s724_s23, 1  ;;  %p156_p7 = scmp.eq.s32.totalorder %s153_s29, 0 }
   0xb   : > { %p806_p8 = por %p175_p5, %p174_p3  ;;  %p228_p9 = scmp.lt.s32.totalorder %s724_s23, 3 }
   0xc   : > { %s812_s6 = scalar_select %p156_p7, %s712_s20, %s158_s27  }
   0xd   : > { %p229_p10 = pnand %p561_p6, %p228_p9 }
   0xe   : > { %p270_p11 = scmp.lt.s32.totalorder (!%p229_p10), %s716_s21, 1  ;;  %s266_s12 = sand.u32 (!%p229_p10), 1, %s708_s19  }
   0xf   : > { %232 = sbr.rel (%p229_p10) target bundleno = 193 (0xc1), region = 40  ;;  %s586_s14 = sshll.u32 (!%p229_p10), %s716_s21, 5 }
  0x10   : > { %s443_s27 = scalar_lea.sflag (!%p229_p10), [#allocation3], %s266_s12 }
  0x14   : > { %v418_v0 = vld [vmem:[%s893_s4] sm:$0xff]  ;;  %s271_s9 = scalar_select %p270_p11, %s716_s21, 1  ;;  %v726_v1 = vmov 0   ;;  %v419_v3 = vld [vmem:[%s893_s4 + $0x8] sm:$0xff]  ;;  %vm307_vm0 = vcmask 1043456   ;;  %vm300_vm1 = vcmask 31744  }
  0x15   : > { %645 = vset.pattern.permute.xlu0 %v726_v1  ;;  %v293_v5 = vld [vmem:[%s892_s3] sm:$0xff]  ;;  %v294_v9 = vld [vmem:[%s892_s3 + $0x8] sm:$0xff] }
  0x16   : > { %422 = vperm.xlu0 %645, %v418_v0   ;;  %s584_s10 = sshll.u32 %s271_s9, 3  ;;  %v290_v8 = vld [vmem:[%s891_s2] sm:$0xff]  ;;  %v291_v12 = vld [vmem:[%s891_s2 + $0x8] sm:$0xff] }
  0x17   : > { %s287_s13 = scalar_lea.vmem %s890_s1, %s584_s10  ;;  %s277_s24 = scalar_lea.vmem %s889_s0, %s584_s10 }
  0x18   : > { %v295_v2 = vld [vmem:[%s287_s13] sm:$0xff]  ;;  %s562_s13 = sshll.u32 %s266_s12, 5  ;;  %s666_s10 = scalar_lea.hbm %s894_s5, 64 }
  0x19   : > { %297 = vst [vmem:[#allocation1] ss:$2 sm:$0xff] %v295_v2  ;;  %v292_v4 = vld [vmem:[%s277_s24] sm:$0xff]  ;;  %s268_s15 = scalar_lea.vmem [#allocation2], %s562_s13  ;;  %s456_s24 = scalar_lea.hbm %s894_s5, %s586_s14 }
  0x1a   : > { %s457_s25 = sshll.u32 %s268_s15, 4  ;;  %s459_s21 = sshll.u32 %s456_s24, 4  ;;  %s458_s25 = int_to_ptr.vmem [resolvable:$true] %s457_s25  ;;  %s460_s21 = int_to_ptr.hbm [resolvable:$true] %s459_s21 }
  0x1b   : > { %s660_s29 = sshra.s32 %s460_s21, 4  ;;  %s661_s29 = int_to_ptr.hbm [resolvable:$true] %s660_s29 }
  0x1c   : > { %s662_s7 = scalar_lea.hbm %s661_s29, 32  ;;  %p667_p1 = scmp.lt.s32.totalorder %s661_s29, %s894_s5 }
  0x1d   : > { %p663_p12 = scmp.ne.s32.totalorder %s661_s29, %s662_s7  ;;  %p668_p2 = scmp.lt.s32.totalorder %s666_s10, %s662_s7 }
  0x1e   : > { %427 = vperm.xlu0 %645, %v419_v3  }
  0x1f   : > { %p664_p13 = pnand %p663_p12, %p799_p4  ;;  %p669_p3 = por %p668_p2, %p667_p1 }
  0x20   : > { %v298_v6 = vld.sshfl [vmem:[#allocation1] sm:$0xff pattern:$0x75316420]  ;;  %v299_v7 = vld.sshfl [vmem:[#allocation1 + $0x8] sm:$0xff pattern:$0x75316420] }
  0x21   : > { %359 = vst [vmem:[#allocation1] ss:$2 sm:$0xff] %v292_v4  ;;  %567 = vmatpush.msk.msra.mxu0 %vm307_vm0, %v298_v6  ;;  %570 = vmatpush.msk.msra.mxu1 %vm307_vm0, %v299_v7  ;;  %p665_p0 = pneg %p664_p13 }
  0x22   : > { %568 = vmatmul.msk.f32.vlgmr.msra.gmra.mxu0 %vm300_vm1, %v293_v5  ;;  %571 = vmatmul.msk.f32.vlgmr.msra.gmra.mxu1 %vm300_vm1, %v293_v5 }
  0x23   : > { %p670_p5 = pnand %p669_p3, %p665_p0 }
  0x28   : > { %v360_v10 = vld.sshfl [vmem:[#allocation1] sm:$0xff pattern:$0x75316420]  ;;  %v361_v11 = vld.sshfl [vmem:[#allocation1 + $0x8] sm:$0xff pattern:$0x75316420] }
  0x29   : > { %573 = vmatpush.msk.msra.mxu2 %vm307_vm0, %v360_v10  ;;  %576 = vmatpush.msk.msra.mxu3 %vm307_vm0, %v361_v11 }
  0x2a   : > { %574 = vmatmul.msk.f32.vlgmr.msra.gmra.mxu2 %vm300_vm1, %v290_v8  ;;  %577 = vmatmul.msk.f32.vlgmr.msra.gmra.mxu3 %vm300_vm1, %v290_v8 }
  0x2b   : > { %569 = vmatmul.msk.f32.gmra.mxu0 %vm300_vm1, %v294_v9  ;;  %572 = vmatmul.msk.f32.gmra.mxu1 %vm300_vm1, %v294_v9 }
  0x32   : > { %575 = vmatmul.msk.f32.gmra.mxu2 %vm300_vm1, %v291_v12  ;;  %578 = vmatmul.msk.f32.gmra.mxu3 %vm300_vm1, %v291_v12 }
  0x88   : > { %v423_v15 = vpop.permute.xlu0 %422 }
  0x90   : > { %v428_v30 = vpop.permute.xlu0 %427 }
  0x9f   : > { %v329_v13 = vpop.f32.mrf.mxu0  ;;  %v352_v14 = vpop.f32.mrf.mxu1 }
  0xa8   : > { %v332_v24 = vpop.f32.mrf.mxu0  ;;  %v355_v25 = vpop.f32.mrf.mxu1 }
  0xad   : > { %v389_v16 = vpop.f32.mrf.mxu2  ;;  %v412_v17 = vpop.f32.mrf.mxu3 }
  0xae   : > { %v390_v18 = vadd.f32 %v389_v16, %v329_v13  ;;  %v413_v19 = vadd.f32 %v412_v17, %v352_v14 }
  0xb0   : > { %v430_v20 = vadd.f32 %v423_v15, %v390_v18  ;;  %v431_v21 = vadd.f32 %v423_v15, %v413_v19 }
  0xb2   : > { %v434_v22 = vmax.f32 %v430_v20, 0.0  ;;  %v435_v23 = vmax.f32 %v431_v21, 0.0 }
  0xb4   : > { %438 = vst [vmem:[%s268_s15] sm:$0xff] %v434_v22 }
  0xb5   : > { %439 = vst [vmem:[%s268_s15 + $0x8] sm:$0xff] %v435_v23  ;;  %v392_v26 = vpop.f32.mrf.mxu2  ;;  %v415_v27 = vpop.f32.mrf.mxu3 }
  0xb6   : > { %v393_v28 = vadd.f32 %v392_v26, %v332_v24  ;;  %v416_v29 = vadd.f32 %v415_v27, %v355_v25 }
  0xb8   : > { %v432_v31 = vadd.f32 %v428_v30, %v393_v28  ;;  %v433_v32 = vadd.f32 %v428_v30, %v416_v29 }
  0xba   : > { %v436_v33 = vmax.f32 %v432_v31, 0.0  ;;  %v437_v34 = vmax.f32 %v433_v32, 0.0 }
  0xbc   : > { %440 = vst [vmem:[%s268_s15 + $0x10] sm:$0xff] %v436_v33 }
  0xbd   : > { %441 = vst [vmem:[%s268_s15 + $0x18] sm:$0xff] %v437_v34 }
  0xbe   : > { %673 = shalt.err (!%p670_p5)
}
  0xbf   : > { %s727_s12 = smov 256   ;;  %s728_s14 = smov 16  }
  0xc0   : > { %587 = dma.vmem_to_hbm [thread:$0]  (%p799_p4), %s458_s25, 512, %s460_s21, %s443_s27, %s727_s12, %s727_s12, %s728_s14  }
  0xc1 PF: > { %p593_p6 = scmp.ge.s32.totalorder %s724_s23, 2  ;;  %s474_s15 = sand.u32 1, %s704_s18  }
  0xc2   : > { %s475_s16 = scalar_lea.sflag [#allocation3], %s474_s15 }
  0xc3   : > { %p590_p7 = pnand %p593_p6, %p806_p8 }
  0xc5   : > { %p591_p9 = pneg %p590_p7 }
  0xc7   : > { %699 = dma.done.wait (%p591_p9), %s475_s16, 512  }
  0xc8   : > { %701 = vsyncadd (%p591_p9), %s475_s16, 4294966784  ;;  %s18_s23 = sadd.s32 1, %s724_s23   ;;  %s897_s18 = smov %s708_s19 }
  0xc9   : > { %p15_p10 = scmp.ge.s32.totalorder %s18_s23, 4   ;;  %s898_s19 = smov %s712_s20 }
  0xca   : > { %s899_s20 = smov %s812_s6  ;;  %s900_s21 = smov %s720_s22 }
  0xcb   : > { %s901_s22 = smov %s903_s26  ;;  %17 = sbr.rel (!%p15_p10) target bundleno = 4 (0x4), region = 78 }
  0xd0   :  { %481 = vsyncpa [#allocation3], 1 }
  0xd1   :  { %483 = vsyncpa [#allocation3 + $0x1], 1 }

</bundles_post_ra>
